<compile_context>
chip_gen: v5e
topology: v5e:2x2
jax: 0.10.0
libtpu: 0.0.40
codegen_flags: <defaults>
</compile_context>

<pallas_src>
import functools

import jax
import jax.numpy as jnp
from jax import lax
from jax.experimental import pallas as pl
from jax.experimental.pallas import tpu as pltpu


_MASK_VALUE = -1e30  # finite large-negative mask (matches torch masked_fill style)


# ----------------------------- helpers --------------------------------------


def _round_up(n, m):
    return ((n + m - 1) // m) * m


def _tpu_generation():
    """Best-effort TPU generation from device_kind (e.g. 'TPU v5 lite' -> 5)."""
    kind = jax.devices()[0].device_kind.lower()
    for g in range(9, 1, -1):
        if (f"v{g}" in kind) or (f"tpu{g}" in kind):
            return g
    return 6


def _pad_last(a, n):
    pad = n - a.shape[-1]
    if pad == 0:
        return a
    return jnp.pad(a, [(0, 0)] * (a.ndim - 1) + [(0, pad)])


def _pad_last2(a, rows, cols):
    pr = rows - a.shape[-2]
    pc = cols - a.shape[-1]
    if pr == 0 and pc == 0:
        return a
    return jnp.pad(a, [(0, 0)] * (a.ndim - 2) + [(0, pr), (0, pc)])


def _layernorm_padded(y, gamma, beta, lane_valid, inv_n, eps=1e-5):
    """Two-pass LayerNorm over the first n_true features of a lane-padded y.

    Padded lanes of y / gamma / beta are zero; `lane_valid` masks them out of
    the centered values so the variance matches an unpadded LayerNorm exactly.
    """
    mean = jnp.sum(y, axis=-1, keepdims=True) * inv_n
    d = jnp.where(lane_valid, y - mean, 0.0)
    var = jnp.sum(d * d, axis=-1, keepdims=True) * inv_n
    return d * lax.rsqrt(var + eps) * gamma + beta


# ----------------------------- kernel ----------------------------------------


def transformer_block_kernel(
    xq_ref,   # (1, TQ, Ep) f32   query tile of x (residual path, exact)
    k_ref,    # (1, 1, Tp, Ep) bf16  this (batch, head)'s precomputed keys
    v_ref,    # (1, 1, Tp, Ep) bf16  this (batch, head)'s precomputed values
    wq_ref,   # (1, Ep, Ep) bf16  this head's query projection (scale folded in)
    wu_ref,   # (1, Ep, Ep) bf16  this head's slice of the unify projection
    wf1_ref,  # (Ep, FFp)  bf16
    wf2_ref,  # (FFp, Ep)  bf16
    vec_ref,  # (8, Ep) f32: rows = bu, g1, be1, bf2, g2, be2, 0, 0
    bf1_ref,  # (1, FFp) f32
    o_ref,    # (1, TQ, Ep)
    acc_ref,  # (TQ, Ep) f32 scratch: unify-projected attention summed over heads
    *,
    heads,
    e_true,
    t_true,
    causal_mask,
    use_bf16_exp,
):
    f32 = jnp.float32
    bf16 = jnp.bfloat16

    hi = pl.program_id(2)

    @pl.when(hi == 0)
    def _init():
        acc_ref[...] = jnp.zeros_like(acc_ref)

    xq_f32 = xq_ref[0]                       # (TQ, Ep) f32
    tq, ep = xq_f32.shape
    k = k_ref[0, 0]                          # (Tp, Ep) bf16
    v = v_ref[0, 0]                          # (Tp, Ep) bf16
    t_pad = k.shape[0]

    # ---- this head's attention (K/V precomputed outside the kernel) --------
    q = jnp.dot(xq_f32.astype(bf16), wq_ref[0], preferred_element_type=f32)

    s = lax.dot_general(q.astype(bf16), k,
                        dimension_numbers=(((1,), (1,)), ((), ())),
                        preferred_element_type=f32)           # (TQ, Tp)

    need_key_mask = t_pad > t_true
    if need_key_mask or causal_mask:
        col = lax.broadcasted_iota(jnp.int32, (tq, t_pad), 1)
        invalid = jnp.zeros((tq, t_pad), jnp.bool_)
        if need_key_mask:
            invalid = col >= t_true
        if causal_mask:
            row = (lax.broadcasted_iota(jnp.int32, (tq, t_pad), 0)
                   + pl.program_id(1) * tq)
            invalid = jnp.logical_or(invalid, col > row)
        s = jnp.where(invalid, _MASK_VALUE, s)

    m = jnp.max(s, axis=-1, keepdims=True)
    if use_bf16_exp:
        # max-subtracted exponent is in (-inf, 0]; bf16 EUP exp is safe here.
        p = jnp.exp((s - m).astype(bf16)).astype(f32)
    else:
        p = jnp.exp(s - m)
    att = p * pl.reciprocal(jnp.sum(p, axis=-1, keepdims=True), approx=True)

    ctx = jnp.dot(att.astype(bf16), v, preferred_element_type=f32)      # (TQ,Ep)
    acc_ref[...] += jnp.dot(ctx.astype(bf16), wu_ref[0],
                            preferred_element_type=f32)

    # ---- epilogue (last head): unify bias, residual+LN, FFN, residual+LN ---
    @pl.when(hi == heads - 1)
    def _epilogue():
        vecs = vec_ref[...]
        bu, g1, be1 = vecs[0:1, :], vecs[1:2, :], vecs[2:3, :]
        bf2, g2, be2 = vecs[3:4, :], vecs[4:5, :], vecs[5:6, :]

        lane_valid = lax.broadcasted_iota(jnp.int32, (1, ep), 1) < e_true
        inv_n = 1.0 / float(e_true)

        # dropout layers are identity in eval mode
        attended = acc_ref[...] + bu
        y = _layernorm_padded(attended + xq_f32, g1, be1, lane_valid, inv_n)

        hid = jnp.dot(y.astype(bf16), wf1_ref[...],
                      preferred_element_type=f32) + bf1_ref[...]
        hid = jnp.maximum(hid, 0.0)
        ff = jnp.dot(hid.astype(bf16), wf2_ref[...],
                     preferred_element_type=f32) + bf2

        z = _layernorm_padded(ff + y, g2, be2, lane_valid, inv_n)
        o_ref[0] = z.astype(o_ref.dtype)


# ----------------------------- wrapper ----------------------------------------


def _build_pallas_call(b, t_pad, tq, e_pad, ff_pad, heads, e_true, t_true,
                       mask, out_dtype, use_bf16_exp, vmem_limit_bytes):
    kernel = functools.partial(
        transformer_block_kernel, heads=heads, e_true=e_true, t_true=t_true,
        causal_mask=mask, use_bf16_exp=use_bf16_exp)

    return pl.pallas_call(
        kernel,
        out_shape=jax.ShapeDtypeStruct((b, t_pad, e_pad), out_dtype),
        grid_spec=pltpu.PrefetchScalarGridSpec(
            num_scalar_prefetch=0,
            grid=(b, t_pad // tq, heads),
            in_specs=[
                pl.BlockSpec((1, tq, e_pad), lambda bi, qi, hi: (bi, qi, 0)),
                pl.BlockSpec((1, 1, t_pad, e_pad), lambda bi, qi, hi: (bi, hi, 0, 0)),
                pl.BlockSpec((1, 1, t_pad, e_pad), lambda bi, qi, hi: (bi, hi, 0, 0)),
                pl.BlockSpec((1, e_pad, e_pad), lambda bi, qi, hi: (hi, 0, 0)),
                pl.BlockSpec((1, e_pad, e_pad), lambda bi, qi, hi: (hi, 0, 0)),
                pl.BlockSpec((e_pad, ff_pad), lambda bi, qi, hi: (0, 0)),
                pl.BlockSpec((ff_pad, e_pad), lambda bi, qi, hi: (0, 0)),
                pl.BlockSpec((8, e_pad), lambda bi, qi, hi: (0, 0)),
                pl.BlockSpec((1, ff_pad), lambda bi, qi, hi: (0, 0)),
            ],
            out_specs=pl.BlockSpec((1, tq, e_pad), lambda bi, qi, hi: (bi, qi, 0)),
            scratch_shapes=[pltpu.VMEM((tq, e_pad), jnp.float32)],
        ),
        compiler_params=pltpu.CompilerParams(
            dimension_semantics=("parallel", "parallel", "arbitrary"),
            vmem_limit_bytes=vmem_limit_bytes),
    )


def transformer_block(x, params, *, heads, mask=False):
    """x: (B, T, E) float32. params: dict of weights (see init_params)."""
    b, t, e = x.shape
    ff = params["wf1"].shape[1]

    gen = _tpu_generation()
    tq_cap = 128 if gen <= 5 else 256          # v5e MXU is 4x128x128
    use_bf16_exp = gen >= 6                    # bf16 EUP exp on v6e / v7x
    vmem_limit = (56 if gen >= 7 else 96) * 1024 * 1024   # 64 MiB vs 128 MiB parts

    e_pad = _round_up(e, 128)
    ff_pad = _round_up(ff, 128)
    tq = min(tq_cap, _round_up(t, 8))
    t_pad = _round_up(t, tq)                   # never fall back to TQ = T

    f32, bf16 = jnp.float32, jnp.bfloat16

    # Query/residual activations stay f32, padded lane-dense + to T_pad rows.
    x_p = _pad_last(jnp.pad(x.astype(f32), ((0, 0), (0, t_pad - t), (0, 0))), e_pad)

    scale = 1.0 / (float(e) ** 0.5)            # == the two e^-0.25 factors

    def per_head(w):                            # (E, H*E) -> (H, Ep, Ep)
        w = w.reshape(e, heads, e).transpose(1, 0, 2)
        return _pad_last2(w, e_pad, e_pad)

    wq = (per_head(params["wq"]) * scale).astype(bf16)   # scale folded into wq
    wk = per_head(params["wk"]).astype(bf16)
    wv = per_head(params["wv"]).astype(bf16)
    wu = _pad_last2(params["wu"].reshape(heads, e, e), e_pad, e_pad).astype(bf16)
    wf1 = _pad_last2(params["wf1"], e_pad, ff_pad).astype(bf16)
    wf2 = _pad_last2(params["wf2"], ff_pad, e_pad).astype(bf16)

    # Precompute per-head K/V once (bf16 operands, f32 accumulation) with a
    # plain XLA batched matmul; the kernel streams them per (batch, head).
    x_bf = x_p.astype(bf16)
    k_all = jnp.einsum("bte,hef->bhtf", x_bf, wk,
                       preferred_element_type=f32).astype(bf16)
    v_all = jnp.einsum("bte,hef->bhtf", x_bf, wv,
                       preferred_element_type=f32).astype(bf16)

    # Pack the six tiny (1, E) vectors into a single (8, Ep) f32 slab.
    def vec(name):
        return _pad_last(params[name].reshape(-1).astype(f32), e_pad)
    zero_row = jnp.zeros((e_pad,), f32)
    vecs = jnp.stack([vec("bu"), vec("g1"), vec("be1"),
                      vec("bf2"), vec("g2"), vec("be2"),
                      zero_row, zero_row], axis=0)
    bf1 = _pad_last(params["bf1"].astype(f32), ff_pad)   # (1, FF_pad)

    out_p = _build_pallas_call(
        b, t_pad, tq, e_pad, ff_pad, heads, e, t, mask, x.dtype,
        use_bf16_exp, vmem_limit)(
        x_p, k_all, v_all, wq, wu, wf1, wf2, vecs, bf1)
    return out_p[:, :t, :e]


# ----------------------------- params / reference ----------------------------


def init_params(key, emb, heads, ff_hidden_mult=4, dtype=jnp.float32):
    he = heads * emb
    ffh = ff_hidden_mult * emb
    ks = jax.random.split(key, 8)
    scale = 0.05
    return {
        "wk": scale * jax.random.normal(ks[0], (emb, he), dtype),
        "wq": scale * jax.random.normal(ks[1], (emb, he), dtype),
        "wv": scale * jax.random.normal(ks[2], (emb, he), dtype),
        "wu": scale * jax.random.normal(ks[3], (he, emb), dtype),
        "bu": scale * jax.random.normal(ks[4], (1, emb), dtype),
        "g1": jnp.ones((1, emb), dtype),
        "be1": jnp.zeros((1, emb), dtype),
        "wf1": scale * jax.random.normal(ks[5], (emb, ffh), dtype),
        "bf1": scale * jax.random.normal(ks[6], (1, ffh), dtype),
        "wf2": scale * jax.random.normal(ks[7], (ffh, emb), dtype),
        "bf2": jnp.zeros((1, emb), dtype),
        "g2": jnp.ones((1, emb), dtype),
        "be2": jnp.zeros((1, emb), dtype),
    }


def reference_transformer_block(x, params, *, heads, mask=False):
    """Pure-JAX f32 reference mirroring the PyTorch forward (wide attention)."""
    b, t, e = x.shape
    scale = 1.0 / (float(e) ** 0.25)
    keys = (x @ params["wk"]).reshape(b, t, heads, e)
    queries = (x @ params["wq"]).reshape(b, t, heads, e)
    values = (x @ params["wv"]).reshape(b, t, heads, e)
    q = jnp.transpose(queries, (0, 2, 1, 3)) * scale   # (b, h, t, e)
    k = jnp.transpose(keys, (0, 2, 1, 3)) * scale
    v = jnp.transpose(values, (0, 2, 1, 3))
    dot = jnp.einsum("bhqe,bhke->bhqk", q, k)
    if mask:
        row = jnp.arange(t)[:, None]
        col = jnp.arange(t)[None, :]
        dot = jnp.where(col > row, _MASK_VALUE, dot)
    dot = jax.nn.softmax(dot, axis=-1)
    out = jnp.einsum("bhqk,bhke->bhqe", dot, v)
    out = jnp.transpose(out, (0, 2, 1, 3)).reshape(b, t, heads * e)
    attended = out @ params["wu"] + params["bu"][0]

    def ln(y, g, bta):
        m = jnp.mean(y, axis=-1, keepdims=True)
        var = jnp.mean((y - m) ** 2, axis=-1, keepdims=True)
        return (y - m) / jnp.sqrt(var + 1e-5) * g[0] + bta[0]

    y = ln(attended + x, params["g1"], params["be1"])
    hid = jnp.maximum(y @ params["wf1"] + params["bf1"][0], 0.0)
    ffo = hid @ params["wf2"] + params["bf2"][0]
    return ln(ffo + y, params["g2"], params["be2"])


# ----------------------------- test -------------------------------------------


if __name__ == "__main__":
    B, T, EMB, HEADS = 2, 8, 32, 4
    MASK = False  # causal masking also supported via mask=True

    key = jax.random.PRNGKey(0)
    kx, kp = jax.random.split(key)
    x = jax.random.normal(kx, (B, T, EMB), jnp.float32)
    params = init_params(kp, EMB, HEADS, ff_hidden_mult=4)

    out = transformer_block(x, params, heads=HEADS, mask=MASK)
    out = jax.block_until_ready(out)

    ref = reference_transformer_block(x, params, heads=HEADS, mask=MASK)
    assert out.shape == (B, T, EMB)
    # bf16 MXU matmuls / bf16 exp (f32 accumulation) vs. the pure-f32 reference.
    err = float(jnp.max(jnp.abs(out - ref)))
    assert err < 5e-2, err

    print("KERNEL_OK")
</pallas_src>

<mosaic_0001>
module attributes {stable_mosaic.version = 11 : i64} {
  func.func @transformer_block_kernel(%arg0: i32, %arg1: i32, %arg2: i32, %arg3: memref<1x8x128xf32, #tpu.memory_space<vmem>>, %arg4: memref<1x1x8x128xbf16, #tpu.memory_space<vmem>>, %arg5: memref<1x1x8x128xbf16, #tpu.memory_space<vmem>>, %arg6: memref<1x128x128xbf16, #tpu.memory_space<vmem>>, %arg7: memref<1x128x128xbf16, #tpu.memory_space<vmem>>, %arg8: memref<128x128xbf16, #tpu.memory_space<vmem>>, %arg9: memref<128x128xbf16, #tpu.memory_space<vmem>>, %arg10: memref<8x128xf32, #tpu.memory_space<vmem>>, %arg11: memref<1x128xf32, #tpu.memory_space<vmem>>, %arg12: memref<1x8x128xf32, #tpu.memory_space<vmem>>, %arg13: memref<8x128xf32, #tpu.memory_space<vmem>>) attributes {dimension_semantics = [#tpu.dimension_semantics<parallel>, #tpu.dimension_semantics<parallel>, #tpu.dimension_semantics<arbitrary>], iteration_bounds = array<i64: 2, 1, 4>, scalar_prefetch = 0 : i64, scratch_operands = 1 : i64, tpu.core_type = #tpu.core_type<tc>, window_params = [{transform_indices = @transform_0, window_bounds = array<i64: 1, 8, 128>}, {transform_indices = @transform_1, window_bounds = array<i64: 1, 1, 8, 128>}, {transform_indices = @transform_2, window_bounds = array<i64: 1, 1, 8, 128>}, {transform_indices = @transform_3, window_bounds = array<i64: 1, 128, 128>}, {transform_indices = @transform_4, window_bounds = array<i64: 1, 128, 128>}, {pipeline_mode = #tpu.pipeline_mode<synchronous>, transform_indices = @transform_5, window_bounds = array<i64: 128, 128>}, {pipeline_mode = #tpu.pipeline_mode<synchronous>, transform_indices = @transform_6, window_bounds = array<i64: 128, 128>}, {pipeline_mode = #tpu.pipeline_mode<synchronous>, transform_indices = @transform_7, window_bounds = array<i64: 8, 128>}, {pipeline_mode = #tpu.pipeline_mode<synchronous>, transform_indices = @transform_8, window_bounds = array<i64: 1, 128>}, {transform_indices = @transform_9, window_bounds = array<i64: 1, 8, 128>}]} {
    %c0_i32 = arith.constant 0 : i32
    %0 = arith.cmpi eq, %arg2, %c0_i32 : i32
    %1 = arith.extui %0 : i1 to i32
    %c0_i32_0 = arith.constant 0 : i32
    %2 = arith.cmpi ne, %1, %c0_i32_0 : i32
    scf.if %2 {
      %cst_27 = arith.constant 0.000000e+00 : f32
      %39 = vector.broadcast %cst_27 : f32 to vector<8x128xf32>
      %c0_28 = arith.constant 0 : index
      %c0_29 = arith.constant 0 : index
      %40 = vector.load %arg13[%c0_28, %c0_29] : memref<8x128xf32, #tpu.memory_space<vmem>>, vector<8x128xf32>
      tpu.vector_store %arg13[%c0_28, %c0_29], %39 {strides = array<i32>} : memref<8x128xf32, #tpu.memory_space<vmem>>, vector<8x128xf32>,
    } else {
    }
    %c0 = arith.constant 0 : index
    %c0_1 = arith.constant 0 : index
    %c0_2 = arith.constant 0 : index
    %3 = vector.load %arg3[%c0, %c0_1, %c0_2] : memref<1x8x128xf32, #tpu.memory_space<vmem>>, vector<1x8x128xf32>
    %4 = vector.shape_cast %3 : vector<1x8x128xf32> to vector<8x128xf32>
    %c0_3 = arith.constant 0 : index
    %c0_4 = arith.constant 0 : index
    %c0_5 = arith.constant 0 : index
    %c0_6 = arith.constant 0 : index
    %5 = vector.load %arg4[%c0_3, %c0_4, %c0_5, %c0_6] : memref<1x1x8x128xbf16, #tpu.memory_space<vmem>>, vector<1x1x8x128xbf16>
    %6 = vector.shape_cast %5 : vector<1x1x8x128xbf16> to vector<8x128xbf16>
    %c0_7 = arith.constant 0 : index
    %c0_8 = arith.constant 0 : index
    %c0_9 = arith.constant 0 : index
    %c0_10 = arith.constant 0 : index
    %7 = vector.load %arg5[%c0_7, %c0_8, %c0_9, %c0_10] : memref<1x1x8x128xbf16, #tpu.memory_space<vmem>>, vector<1x1x8x128xbf16>
    %8 = vector.shape_cast %7 : vector<1x1x8x128xbf16> to vector<8x128xbf16>
    %9 = arith.truncf %4 : vector<8x128xf32> to vector<8x128xbf16>
    %c0_11 = arith.constant 0 : index
    %c0_12 = arith.constant 0 : index
    %c0_13 = arith.constant 0 : index
    %10 = vector.load %arg6[%c0_11, %c0_12, %c0_13] : memref<1x128x128xbf16, #tpu.memory_space<vmem>>, vector<1x128x128xbf16>
    %11 = vector.shape_cast %10 : vector<1x128x128xbf16> to vector<128x128xbf16>
    %cst = arith.constant dense<0.000000e+00> : vector<8x128xf32>
    %12 = tpu.matmul %9, %11, %cst {dimension_numbers = #tpu.dot_dimension_numbers<[1], [0], [0], [1], [0, 0, 1, 1], [], []>} : vector<8x128xbf16>, vector<128x128xbf16>, vector<8x128xf32> -> vector<8x128xf32>
    %13 = arith.truncf %12 : vector<8x128xf32> to vector<8x128xbf16>
    %cst_14 = arith.constant dense<0.000000e+00> : vector<8x8xf32>
    %14 = tpu.matmul %13, %6, %cst_14 {dimension_numbers = #tpu.dot_dimension_numbers<[1], [1], [0], [0], [0, 0, 1, 0], [], []>} : vector<8x128xbf16>, vector<8x128xbf16>, vector<8x8xf32> -> vector<8x8xf32>
    %cst_15 = arith.constant dense<0xFF800000> : vector<8xf32>
    %15 = vector.multi_reduction <maximumf>, %14, %cst_15 [1] : vector<8x8xf32> to vector<8xf32>
    %16 = vector.shape_cast %15 : vector<8xf32> to vector<8x1xf32>
    %17 = vector.broadcast %16 : vector<8x1xf32> to vector<8x8xf32>
    %18 = arith.subf %14, %17 : vector<8x8xf32>
    %19 = arith.truncf %18 : vector<8x8xf32> to vector<8x8xbf16>
    %20 = math.exp %19 : vector<8x8xbf16>
    %21 = arith.extf %20 : vector<8x8xbf16> to vector<8x8xf32>
    %cst_16 = arith.constant dense<0.000000e+00> : vector<8xf32>
    %22 = vector.multi_reduction <add>, %21, %cst_16 [1] : vector<8x8xf32> to vector<8xf32>
    %23 = vector.shape_cast %22 : vector<8xf32> to vector<8x1xf32>
    %24 = tpu.reciprocal %23 {approx = true} : vector<8x1xf32> -> vector<8x1xf32>
    %25 = vector.broadcast %24 : vector<8x1xf32> to vector<8x8xf32>
    %26 = arith.mulf %21, %25 : vector<8x8xf32>
    %27 = arith.truncf %26 : vector<8x8xf32> to vector<8x8xbf16>
    %cst_17 = arith.constant dense<0.000000e+00> : vector<8x128xf32>
    %28 = tpu.matmul %27, %8, %cst_17 {dimension_numbers = #tpu.dot_dimension_numbers<[1], [0], [0], [1], [0, 0, 1, 1], [], []>} : vector<8x8xbf16>, vector<8x128xbf16>, vector<8x128xf32> -> vector<8x128xf32>
    %c0_18 = arith.constant 0 : index
    %c0_19 = arith.constant 0 : index
    %29 = vector.load %arg13[%c0_18, %c0_19] : memref<8x128xf32, #tpu.memory_space<vmem>>, vector<8x128xf32>
    %30 = arith.truncf %28 : vector<8x128xf32> to vector<8x128xbf16>
    %c0_20 = arith.constant 0 : index
    %c0_21 = arith.constant 0 : index
    %c0_22 = arith.constant 0 : index
    %31 = vector.load %arg7[%c0_20, %c0_21, %c0_22] : memref<1x128x128xbf16, #tpu.memory_space<vmem>>, vector<1x128x128xbf16>
    %32 = vector.shape_cast %31 : vector<1x128x128xbf16> to vector<128x128xbf16>
    %cst_23 = arith.constant dense<0.000000e+00> : vector<8x128xf32>
    %33 = tpu.matmul %30, %32, %cst_23 {dimension_numbers = #tpu.dot_dimension_numbers<[1], [0], [0], [1], [0, 0, 1, 1], [], []>} : vector<8x128xbf16>, vector<128x128xbf16>, vector<8x128xf32> -> vector<8x128xf32>
    %34 = arith.addf %29, %33 : vector<8x128xf32>
    %c0_24 = arith.constant 0 : index
    %c0_25 = arith.constant 0 : index
    %35 = vector.load %arg13[%c0_24, %c0_25] : memref<8x128xf32, #tpu.memory_space<vmem>>, vector<8x128xf32>
    tpu.vector_store %arg13[%c0_24, %c0_25], %34 {strides = array<i32>} : memref<8x128xf32, #tpu.memory_space<vmem>>, vector<8x128xf32>,
    %c3_i32 = arith.constant 3 : i32
    %36 = arith.cmpi eq, %arg2, %c3_i32 : i32
    %37 = arith.extui %36 : i1 to i32
    %c0_i32_26 = arith.constant 0 : i32
    %38 = arith.cmpi ne, %37, %c0_i32_26 : i32
    scf.if %38 {
      %c0_27 = arith.constant 0 : index
      %c0_28 = arith.constant 0 : index
      %39 = vector.load %arg10[%c0_27, %c0_28] : memref<8x128xf32, #tpu.memory_space<vmem>>, vector<8x128xf32>
      %40 = vector.extract_strided_slice %39 {offsets = [0, 0], sizes = [1, 128], strides = [1, 1]} : vector<8x128xf32> to vector<1x128xf32>
      %41 = vector.extract_strided_slice %39 {offsets = [1, 0], sizes = [1, 128], strides = [1, 1]} : vector<8x128xf32> to vector<1x128xf32>
      %42 = vector.extract_strided_slice %39 {offsets = [2, 0], sizes = [1, 128], strides = [1, 1]} : vector<8x128xf32> to vector<1x128xf32>
      %43 = vector.extract_strided_slice %39 {offsets = [3, 0], sizes = [1, 128], strides = [1, 1]} : vector<8x128xf32> to vector<1x128xf32>
      %44 = vector.extract_strided_slice %39 {offsets = [4, 0], sizes = [1, 128], strides = [1, 1]} : vector<8x128xf32> to vector<1x128xf32>
      %45 = vector.extract_strided_slice %39 {offsets = [5, 0], sizes = [1, 128], strides = [1, 1]} : vector<8x128xf32> to vector<1x128xf32>
      %46 = tpu.iota {dimensions = array<i32: 1>} : vector<1x128xi32>
      %c32_i32 = arith.constant 32 : i32
      %47 = vector.broadcast %c32_i32 : i32 to vector<1x128xi32>
      %48 = arith.cmpi slt, %46, %47 : vector<1x128xi32>
      %c0_29 = arith.constant 0 : index
      %c0_30 = arith.constant 0 : index
      %49 = vector.load %arg13[%c0_29, %c0_30] : memref<8x128xf32, #tpu.memory_space<vmem>>, vector<8x128xf32>
      %50 = vector.broadcast %40 : vector<1x128xf32> to vector<8x128xf32>
      %51 = arith.addf %49, %50 : vector<8x128xf32>
      %52 = arith.addf %51, %4 : vector<8x128xf32>
      %cst_31 = arith.constant dense<0.000000e+00> : vector<8xf32>
      %53 = vector.multi_reduction <add>, %52, %cst_31 [1] : vector<8x128xf32> to vector<8xf32>
      %54 = vector.shape_cast %53 : vector<8xf32> to vector<8x1xf32>
      %cst_32 = arith.constant 3.125000e-02 : f32
      %55 = vector.broadcast %cst_32 : f32 to vector<8x1xf32>
      %56 = arith.mulf %54, %55 : vector<8x1xf32>
      %57 = vector.broadcast %56 : vector<8x1xf32> to vector<8x128xf32>
      %58 = arith.subf %52, %57 : vector<8x128xf32>
      %cst_33 = arith.constant 0.000000e+00 : f32
      %59 = vector.shape_cast %48 : vector<1x128xi1> to vector<1x128xi1>
      %60 = vector.broadcast %59 : vector<1x128xi1> to vector<8x128xi1>
      %61 = vector.broadcast %cst_33 : f32 to vector<8x128xf32>
      %62 = arith.select %60, %58, %61 : vector<8x128xi1>, vector<8x128xf32>
      %63 = arith.mulf %62, %62 : vector<8x128xf32>
      %cst_34 = arith.constant dense<0.000000e+00> : vector<8xf32>
      %64 = vector.multi_reduction <add>, %63, %cst_34 [1] : vector<8x128xf32> to vector<8xf32>
      %65 = vector.shape_cast %64 : vector<8xf32> to vector<8x1xf32>
      %cst_35 = arith.constant 3.125000e-02 : f32
      %66 = vector.broadcast %cst_35 : f32 to vector<8x1xf32>
      %67 = arith.mulf %65, %66 : vector<8x1xf32>
      %cst_36 = arith.constant 9.99999974E-6 : f32
      %68 = vector.broadcast %cst_36 : f32 to vector<8x1xf32>
      %69 = arith.addf %67, %68 : vector<8x1xf32>
      %70 = math.rsqrt %69 : vector<8x1xf32>
      %71 = vector.broadcast %70 : vector<8x1xf32> to vector<8x128xf32>
      %72 = arith.mulf %62, %71 : vector<8x128xf32>
      %73 = vector.broadcast %41 : vector<1x128xf32> to vector<8x128xf32>
      %74 = arith.mulf %72, %73 : vector<8x128xf32>
      %75 = vector.broadcast %42 : vector<1x128xf32> to vector<8x128xf32>
      %76 = arith.addf %74, %75 : vector<8x128xf32>
      %77 = arith.truncf %76 : vector<8x128xf32> to vector<8x128xbf16>
      %c0_37 = arith.constant 0 : index
      %c0_38 = arith.constant 0 : index
      %78 = vector.load %arg8[%c0_37, %c0_38] : memref<128x128xbf16, #tpu.memory_space<vmem>>, vector<128x128xbf16>
      %cst_39 = arith.constant dense<0.000000e+00> : vector<8x128xf32>
      %79 = tpu.matmul %77, %78, %cst_39 {dimension_numbers = #tpu.dot_dimension_numbers<[1], [0], [0], [1], [0, 0, 1, 1], [], []>} : vector<8x128xbf16>, vector<128x128xbf16>, vector<8x128xf32> -> vector<8x128xf32>
      %c0_40 = arith.constant 0 : index
      %c0_41 = arith.constant 0 : index
      %80 = vector.load %arg11[%c0_40, %c0_41] : memref<1x128xf32, #tpu.memory_space<vmem>>, vector<1x128xf32>
      %81 = vector.broadcast %80 : vector<1x128xf32> to vector<8x128xf32>
      %82 = arith.addf %79, %81 : vector<8x128xf32>
      %cst_42 = arith.constant 0.000000e+00 : f32
      %83 = vector.broadcast %cst_42 : f32 to vector<8x128xf32>
      %84 = arith.maximumf %82, %83 : vector<8x128xf32>
      %85 = arith.truncf %84 : vector<8x128xf32> to vector<8x128xbf16>
      %c0_43 = arith.constant 0 : index
      %c0_44 = arith.constant 0 : index
      %86 = vector.load %arg9[%c0_43, %c0_44] : memref<128x128xbf16, #tpu.memory_space<vmem>>, vector<128x128xbf16>
      %cst_45 = arith.constant dense<0.000000e+00> : vector<8x128xf32>
      %87 = tpu.matmul %85, %86, %cst_45 {dimension_numbers = #tpu.dot_dimension_numbers<[1], [0], [0], [1], [0, 0, 1, 1], [], []>} : vector<8x128xbf16>, vector<128x128xbf16>, vector<8x128xf32> -> vector<8x128xf32>
      %88 = vector.broadcast %43 : vector<1x128xf32> to vector<8x128xf32>
      %89 = arith.addf %87, %88 : vector<8x128xf32>
      %90 = arith.addf %89, %76 : vector<8x128xf32>
      %cst_46 = arith.constant dense<0.000000e+00> : vector<8xf32>
      %91 = vector.multi_reduction <add>, %90, %cst_46 [1] : vector<8x128xf32> to vector<8xf32>
      %92 = vector.shape_cast %91 : vector<8xf32> to vector<8x1xf32>
      %cst_47 = arith.constant 3.125000e-02 : f32
      %93 = vector.broadcast %cst_47 : f32 to vector<8x1xf32>
      %94 = arith.mulf %92, %93 : vector<8x1xf32>
      %95 = vector.broadcast %94 : vector<8x1xf32> to vector<8x128xf32>
      %96 = arith.subf %90, %95 : vector<8x128xf32>
      %cst_48 = arith.constant 0.000000e+00 : f32
      %97 = vector.shape_cast %48 : vector<1x128xi1> to vector<1x128xi1>
      %98 = vector.broadcast %97 : vector<1x128xi1> to vector<8x128xi1>
      %99 = vector.broadcast %cst_48 : f32 to vector<8x128xf32>
      %100 = arith.select %98, %96, %99 : vector<8x128xi1>, vector<8x128xf32>
      %101 = arith.mulf %100, %100 : vector<8x128xf32>
      %cst_49 = arith.constant dense<0.000000e+00> : vector<8xf32>
      %102 = vector.multi_reduction <add>, %101, %cst_49 [1] : vector<8x128xf32> to vector<8xf32>
      %103 = vector.shape_cast %102 : vector<8xf32> to vector<8x1xf32>
      %cst_50 = arith.constant 3.125000e-02 : f32
      %104 = vector.broadcast %cst_50 : f32 to vector<8x1xf32>
      %105 = arith.mulf %103, %104 : vector<8x1xf32>
      %cst_51 = arith.constant 9.99999974E-6 : f32
      %106 = vector.broadcast %cst_51 : f32 to vector<8x1xf32>
      %107 = arith.addf %105, %106 : vector<8x1xf32>
      %108 = math.rsqrt %107 : vector<8x1xf32>
      %109 = vector.broadcast %108 : vector<8x1xf32> to vector<8x128xf32>
      %110 = arith.mulf %100, %109 : vector<8x128xf32>
      %111 = vector.broadcast %44 : vector<1x128xf32> to vector<8x128xf32>
      %112 = arith.mulf %110, %111 : vector<8x128xf32>
      %113 = vector.broadcast %45 : vector<1x128xf32> to vector<8x128xf32>
      %114 = arith.addf %112, %113 : vector<8x128xf32>
      %c0_52 = arith.constant 0 : index
      %c0_53 = arith.constant 0 : index
      %c0_54 = arith.constant 0 : index
      %115 = vector.load %arg12[%c0_52, %c0_53, %c0_54] : memref<1x8x128xf32, #tpu.memory_space<vmem>>, vector<1x8x128xf32>
      %116 = vector.shape_cast %115 : vector<1x8x128xf32> to vector<8x128xf32>
      %117 = vector.shape_cast %114 : vector<8x128xf32> to vector<1x8x128xf32>
      tpu.vector_store %arg12[%c0_52, %c0_53, %c0_54], %117 {strides = array<i32>} : memref<1x8x128xf32, #tpu.memory_space<vmem>>, vector<1x8x128xf32>,
    } else {
    }
    return
  }
  func.func @transform_0(%arg0: i32, %arg1: i32, %arg2: i32) -> (i32, i32, i32) {
    %c0_i32 = arith.constant 0 : i32
    %c0_i32_0 = arith.constant 0 : i32
    return %arg0, %arg1, %c0_i32 : i32, i32, i32
  }
  func.func @transform_1(%arg0: i32, %arg1: i32, %arg2: i32) -> (i32, i32, i32, i32) {
    %c0_i32 = arith.constant 0 : i32
    %c0_i32_0 = arith.constant 0 : i32
    %c0_i32_1 = arith.constant 0 : i32
    return %arg0, %arg2, %c0_i32, %c0_i32_0 : i32, i32, i32, i32
  }
  func.func @transform_2(%arg0: i32, %arg1: i32, %arg2: i32) -> (i32, i32, i32, i32) {
    %c0_i32 = arith.constant 0 : i32
    %c0_i32_0 = arith.constant 0 : i32
    %c0_i32_1 = arith.constant 0 : i32
    return %arg0, %arg2, %c0_i32, %c0_i32_0 : i32, i32, i32, i32
  }
  func.func @transform_3(%arg0: i32, %arg1: i32, %arg2: i32) -> (i32, i32, i32) {
    %c0_i32 = arith.constant 0 : i32
    %c0_i32_0 = arith.constant 0 : i32
    %c0_i32_1 = arith.constant 0 : i32
    return %arg2, %c0_i32, %c0_i32_0 : i32, i32, i32
  }
  func.func @transform_4(%arg0: i32, %arg1: i32, %arg2: i32) -> (i32, i32, i32) {
    %c0_i32 = arith.constant 0 : i32
    %c0_i32_0 = arith.constant 0 : i32
    %c0_i32_1 = arith.constant 0 : i32
    return %arg2, %c0_i32, %c0_i32_0 : i32, i32, i32
  }
  func.func @transform_5(%arg0: i32, %arg1: i32, %arg2: i32) -> (i32, i32) {
    %c0_i32 = arith.constant 0 : i32
    %c0_i32_0 = arith.constant 0 : i32
    %c0_i32_1 = arith.constant 0 : i32
    return %c0_i32, %c0_i32_0 : i32, i32
  }
  func.func @transform_6(%arg0: i32, %arg1: i32, %arg2: i32) -> (i32, i32) {
    %c0_i32 = arith.constant 0 : i32
    %c0_i32_0 = arith.constant 0 : i32
    %c0_i32_1 = arith.constant 0 : i32
    return %c0_i32, %c0_i32_0 : i32, i32
  }
  func.func @transform_7(%arg0: i32, %arg1: i32, %arg2: i32) -> (i32, i32) {
    %c0_i32 = arith.constant 0 : i32
    %c0_i32_0 = arith.constant 0 : i32
    %c0_i32_1 = arith.constant 0 : i32
    return %c0_i32, %c0_i32_0 : i32, i32
  }
  func.func @transform_8(%arg0: i32, %arg1: i32, %arg2: i32) -> (i32, i32) {
    %c0_i32 = arith.constant 0 : i32
    %c0_i32_0 = arith.constant 0 : i32
    %c0_i32_1 = arith.constant 0 : i32
    return %c0_i32, %c0_i32_0 : i32, i32
  }
  func.func @transform_9(%arg0: i32, %arg1: i32, %arg2: i32) -> (i32, i32, i32) {
    %c0_i32 = arith.constant 0 : i32
    %c0_i32_0 = arith.constant 0 : i32
    return %arg0, %arg1, %c0_i32 : i32, i32, i32
  }
}

</mosaic_0001>

<bundles_post_ra>
// kernel: tpu_custom_call.1
= control target key start
LH: loop header
LB: loop body
LE: loop exit
PB: predicated region body
PF: predicated region fallthrough
CT: control target
= control target key end

     0   :  { %s2534_s0 = inlined_call_operand.hbm [shape: f32[2,8,128], index: 0, kind: input, shape index: {}]   ;;  %s2535_s1 = inlined_call_operand.hbm [shape: bf16[2,4,8,128], index: 1, kind: input, shape index: {}]   ;;  %s2536_s2 = inlined_call_operand.hbm [shape: bf16[2,4,8,128], index: 2, kind: input, shape index: {}]   ;;  %s2537_s3 = inlined_call_operand.hbm [shape: bf16[4,128,128], index: 3, kind: input, shape index: {}]   ;;  %s2538_s4 = inlined_call_operand.hbm [shape: bf16[4,128,128], index: 4, kind: input, shape index: {}]   ;;  %s2539_s5 = inlined_call_operand.hbm [shape: bf16[128,128], index: 5, kind: input, shape index: {}]   ;;  %s2540_s6 = inlined_call_operand.hbm [shape: bf16[128,128], index: 6, kind: input, shape index: {}]   ;;  %s2541_s7 = inlined_call_operand.hbm [shape: f32[8,128], index: 7, kind: input, shape index: {}]   ;;  %s2542_s8 = inlined_call_operand.vmem [shape: f32[1,128], index: 8, kind: input, shape index: {}]   ;;  %s2543_s9 = inlined_call_operand.hbm [shape: f32[2,8,128], index: 9, kind: output, shape index: {}]  }
   0x1   :  { %2567 = sst [smem:[#allocation43_spill]] %s2534_s0 }
   0x2   :  { %2568 = sst [smem:[#allocation44_spill]] %s2535_s1 }
   0x3   :  { %2569 = sst [smem:[#allocation45_spill]] %s2536_s2 }
   0x4   :  { %2570 = sst [smem:[#allocation46_spill]] %s2537_s3 }
   0x5   :  { %2571 = sst [smem:[#allocation47_spill]] %s2538_s4 }
   0x6   :  { %2572 = sst [smem:[#allocation48_spill]] %s2539_s5 }
   0x7   :  { %2573 = sst [smem:[#allocation49_spill]] %s2540_s6 }
   0x8   :  { %2574 = sst [smem:[#allocation50_spill]] %s2541_s7 }
   0x9   :  { %2575 = sst [smem:[#allocation51_spill]] %s2542_s8 }
   0xa   :  { %2576 = sst [smem:[#allocation52_spill]] %s2543_s9 }
   0xb   :  { %14 = vsyncpa [#allocation4], 0 }
   0xc   :  { %16 = vsyncpa [#allocation4 + $0x1], 0 }
   0xd   :  { %17 = vsyncpa [#allocation7], 0 }
   0xe   :  { %19 = vsyncpa [#allocation7 + $0x1], 0 }
   0xf   :  { %20 = vsyncpa [#allocation10], 0 }
  0x10   :  { %22 = vsyncpa [#allocation10 + $0x1], 0 }
  0x11   :  { %23 = vsyncpa [#allocation13], 0 }
  0x12   :  { %24 = vsyncpa [#allocation16], 0 }
  0x13   :  { %25 = vsyncpa [#allocation5], 0 }
  0x14   :  { %27 = vsyncpa [#allocation5 + $0x1], 0  ;;  %s2104_s30 = smov 0   ;;  %s2106_s10 = smov 0  }
  0x15   :  { %s2108_s11 = smov 0   ;;  %s2110_s12 = smov 0  }
  0x16   :  { %s2112_s13 = smov 0   ;;  %s2114_s14 = smov 0  }
  0x17   :  { %s2116_s15 = smov 0   ;;  %s2118_s16 = smov 0  }
  0x18   :  { %s2120_s17 = smov 0   ;;  %s2122_s18 = smov 0  }
  0x19   :  { %s2124_s19 = smov 0   ;;  %s2126_s20 = smov 0  }
  0x1a   :  { %s2128_s21 = smov 0   ;;  %s2130_s22 = smov 0  }
  0x1b LB: > { %2577 = sst [smem:[#allocation24_spill]] %s2002_s11  ;;  %s2175_s23 = sadd.s32 4294967295, %s2046_s22   ;;  %s2046_s22 = sphi %s2130_s22, %s33_s22   ;;  %s2042_s21 = sphi %s2128_s21, %s2653_s21   ;;  %s2038_s20 = sphi %s2126_s20, %s2645_s20   ;;  %s2034_s19 = sphi %s2124_s19, %s2644_s19   ;;  %s2030_s18 = sphi %s2122_s18, %s2643_s18   ;;  %s2026_s17 = sphi %s2120_s17, %s2642_s17   ;;  %s2022_s16 = sphi %s2118_s16, %s2652_s16   ;;  %s2018_s15 = sphi %s2116_s15, %s2651_s15   ;;  %s2014_s14 = sphi %s2114_s14, %s2640_s14   ;;  %s2010_s13 = sphi %s2112_s13, %s2639_s13   ;;  %s2006_s12 = sphi %s2110_s12, %s2650_s12   ;;  %s2002_s11 = sphi %s2108_s11, %s2637_s11   ;;  %s1998_s10 = sphi %s2106_s10, %s2649_s10   ;;  %s1994_s30 = sphi %s2104_s30, %s2648_s30  }
  0x1c   : > { %2578 = sst [smem:[#allocation25_spill]] %s2010_s13  ;;  %p1257_p0 = scmp.ge.s32.totalorder %s2046_s22, 1 }
  0x1d   : > { %2579 = sst [smem:[#allocation26_spill]] %s2014_s14  ;;  %p75_p1 = scmp.eq.s32.totalorder %s2175_s23, 0 }
  0x1e   : > { %2580 = sst [smem:[#allocation27_spill]] %s2018_s15  ;;  %p305_p2 = scmp.lt.s32.totalorder %s2046_s22, 9 }
  0x1f   : > { %2581 = sst [smem:[#allocation28_spill]] %s2026_s17  ;;  %s2048_s28 = smov [#allocation12]  }
  0x20   : > { %2582 = sst [smem:[#allocation29_spill]] %s2030_s18  ;;  %p2183_p3 = pnand %p1257_p0, %p305_p2 }
  0x21   : > { %2583 = sst [smem:[#allocation30_spill]] %s2034_s19  ;;  %s318_s29 = sshll.u32 %s2048_s28, 4  ;;  %s319_s29 = int_to_ptr.vmem [resolvable:$true] %s318_s29 }
  0x22   : > { %2584 = sst [smem:[#allocation31_spill]] %s2038_s20  ;;  %p1479_p4 = pneg %p2183_p3 }
  0x23   : > { %2585 = sst [smem:[#allocation32_spill]] %s2042_s21  ;;  %s2545_s25 = smov 64  }
  0x24   : > { %s2586_s5 = sld [smem:[#allocation48_spill]]  ;;  %p2191_p5 = pnand %p1479_p4, %p75_p1 }
  0x25   : > { %s2587_s27 = scalar_select %p2183_p3, 1, 0 }
  0x26   : > { %s45_s28 = sadd.s32 1, %s2038_s20  ;;  %s52_s9 = sadd.s32 1, %s2042_s21 }
  0x27   : > { %2588 = sst [smem:[#allocation33_spill]] %s2587_s27  ;;  %p46_p6 = scmp.ge.s32.totalorder %s45_s28, 4 }
  0x28   : > { %p69_p7 = scmp.eq.s32.totalorder %s2046_s22, 0  ;;  %s89_s19 = sadd.s32 1, %s2014_s14 }
  0x29   : > { %s2655_s28 = smov (%p46_p6, %s45_s28), 0  ;;  %s2657_s9 = smov (!%p46_p6, %s52_s9), %s2042_s21 }
  0x2a   : > { %s316_s26 = sshll.u32 %s2586_s5, 4  ;;  %s2547_s5 = smov 4   ;;  %s317_s26 = int_to_ptr.hbm [resolvable:$true] %s316_s26 }
  0x2b   : > { %1482 = dma.hbm_to_vmem [thread:$0]  (!%p2191_p5), %s317_s26, 1024, %s319_s29, [#allocation13], %s2545_s25, %s2545_s25, %s2547_s5  }
  0x2c   : > { %2590 = sst [smem:[#allocation34_spill]] %s2655_s28  ;;  %s2209_s8 = ssub.s32 %s2038_s20, %s2655_s28 }
  0x2d   : > { %p96_p8 = scmp.ne.s32.totalorder %s2014_s14, %s2010_s13  ;;  %p54_p9 = scmp.ge.s32.totalorder %s2657_s9, 2 }
  0x2e   : > { %p102_p10 = scmp.ne.s32.totalorder %s2010_s13, %s2006_s12  ;;  %p141_p12 = scmp.eq.s32.totalorder %s2209_s8, 0 }
  0x2f   : > { %p2217_p11 = por %p96_p8, %p69_p7  ;;  %s2659_s9 = smov (%p54_p9, %s2657_s9), 0 }
  0x30   : > { %2592 = sst [smem:[#allocation35_spill]] %s2659_s9  ;;  %p2226_p13 = por %p102_p10, %p75_p1 }
  0x31   : > { %p2560_p0 = scmp.lt.s32.totalorder %s2046_s22, 8  ;;  %s2233_s25 = ssub.s32 %s2042_s21, %s2659_s9 }
  0x32   : > { %s2593_s29 = scalar_select %p2226_p13, 1, 0 }
  0x33   : > { %p59_p2 = scmp.eq.s32.totalorder %s2233_s25, 0  ;;  %s86_s5 = sor.u32 %s2209_s8, %s2233_s25 }
  0x34   : > { %2594 = sst [smem:[#allocation36_spill]] %s2593_s29  ;;  %p87_p4 = scmp.eq.s32.totalorder %s86_s5, 0 }
  0x35   : > { %s383_s28 = sand.u32 1, %s2014_s14   ;;  %s1265_s18 = sshll.u32 %s2042_s21, 2 }
  0x36   : > { %s2242_s13 = scalar_select %p87_p4, %s2014_s14, %s89_s19  }
  0x37   : > { %s2244_s9 = sshll.u32 %s383_s28, 2  ;;  %s389_s12 = sadd.s32 %s2038_s20, %s1265_s18 }
  0x38   : > { %2595 = sst [smem:[#allocation37_spill]] %s2242_s13  ;;  %s1266_s29 = sshll.u32 %s389_s12, 2 }
  0x39   : > { %s2596_s1 = sld [smem:[#allocation44_spill]]  ;;  %s385_s21 = scalar_lea.vmem [#allocation6], %s2244_s9 }
  0x3a   : > { %s395_s19 = sshll.u32 %s385_s21, 4  ;;  %p2255_p6 = pnand %p2560_p0, %p2217_p11  ;;  %s396_s19 = int_to_ptr.vmem [resolvable:$true] %s395_s19 }
  0x3b   : > { %s2598_s2 = sld [smem:[#allocation45_spill]]  ;;  %s2599_s27 = sand.u32 1, %s2046_s22  }
  0x3c   : > { %s143_s21 = sadd.s32 1, %s2002_s11  ;;  %p150_p8 = scmp.ne.s32.totalorder %s2002_s11, %s1998_s10 }
  0x3d   : > { %s2277_s26 = scalar_select %p141_p12, %s2002_s11, %s143_s21  }
  0x3e   : > { %p152_p9 = por %p150_p8, %p69_p7  ;;  %p156_p10 = scmp.ne.s32.totalorder %s1998_s10, %s1994_s30 }
  0x3f   : > { %s391_s5 = scalar_lea.hbm %s2596_s1, %s1266_s29  ;;  %s2266_s1 = scalar_lea.sflag [#allocation7], %s2599_s27 }
  0x40   : > { %s393_s13 = sshll.u32 %s391_s5, 4  ;;  %2600 = sst [smem:[#allocation38_spill]] %s2277_s26  ;;  %s394_s13 = int_to_ptr.hbm [resolvable:$true] %s393_s13 }
  0x41   : > { %s2262_s0 = scalar_lea.hbm %s2598_s2, %s1266_s29  ;;  %s425_s5 = sand.u32 1, %s2002_s11  }
  0x42   : > { %1495 = dma.hbm_to_vmem [thread:$0]  (!%p2255_p6), %s394_s13, 64, %s396_s19, %s2266_s1  }
  0x43   : > { %s1421_s18 = sshll.u32 %s2038_s20, 6  ;;  %p2287_p11 = por %p156_p10, %p75_p1 }
  0x44   : > { %s1270_s12 = sshll.u32 %s425_s5, 6  ;;  %s2602_s3 = sld [smem:[#allocation46_spill]] }
  0x45   : > { %s2601_s29 = scalar_select %p2287_p11, 1, 0 }
  0x46   : > { %s427_s8 = scalar_lea.vmem [#allocation9], %s1270_s12  ;;  %p2296_p12 = pnand %p2560_p0, %p152_p9 }
  0x47   : > { %s435_s21 = sshll.u32 %s427_s8, 4  ;;  %s2604_s4 = sld [smem:[#allocation47_spill]]  ;;  %s436_s21 = int_to_ptr.vmem [resolvable:$true] %s435_s21 }
  0x48   : > { %s449_s26 = scalar_lea.vmem [#allocation11], %s1270_s12  ;;  %s2606_s13 = sand.u32 1, %s2046_s22  }
  0x49   : > { %s2303_s11 = sshll.u32 %s449_s26, 4  ;;  %s2607_s8 = smov 4  }
  0x4a   : > { %s432_s19 = scalar_lea.hbm %s2602_s3, %s1421_s18  ;;  %2605 = sst [smem:[#allocation39_spill]] %s2303_s11 }
  0x4b   : > { %s433_s2 = sshll.u32 %s432_s19, 4  ;;  %s2307_s19 = scalar_lea.sflag [#allocation10], %s2606_s13  ;;  %s434_s2 = int_to_ptr.hbm [resolvable:$true] %s433_s2 }
  0x4c   : > { %s2608_s3 = smov 64   ;;  %s2609_s6 = sld [smem:[#allocation49_spill]] }
  0x4d   : > { %s454_s5 = scalar_lea.hbm %s2604_s4, %s1421_s18  ;;  %s2051_s18 = smov [#allocation14]  }
  0x4e   : > { %s455_s27 = sshll.u32 %s454_s5, 4  ;;  %s332_s12 = sshll.u32 %s2051_s18, 4  ;;  %s2315_s27 = int_to_ptr.hbm [resolvable:$true] %s455_s27  ;;  %s333_s12 = int_to_ptr.vmem [resolvable:$true] %s332_s12 }
  0x4f   : > { %1501 = dma.hbm_to_vmem [thread:$0]  (!%p2296_p12), %s434_s2, 1024, %s436_s21, %s2307_s19, %s2608_s3, %s2608_s3, %s2607_s8  }
  0x50   : > { %s2610_s7 = sld [smem:[#allocation50_spill]]  ;;  %s2052_s13 = smov [#allocation15]  }
  0x51   : > { %s2611_s14 = sld [smem:[#allocation32_spill]]  ;;  %s347_s20 = sshll.u32 %s2052_s13, 4  ;;  %s348_s20 = int_to_ptr.vmem [resolvable:$true] %s347_s20 }
  0x52   : > { %s330_s26 = sshll.u32 %s2609_s6, 4  ;;  %s1256_s18 = sadd.s32 4294967294, %s2046_s22   ;;  %s331_s26 = int_to_ptr.hbm [resolvable:$true] %s330_s26 }
  0x53   : > { %1485 = dma.hbm_to_vmem [thread:$0]  (!%p2191_p5), %s331_s26, 1024, %s333_s12, [#allocation13], %s2608_s3, %s2608_s3, %s2607_s8  }
  0x54   : > { %s61_s11 = sadd.s32 1, %s2026_s17  ;;  %p68_p4 = scmp.ne.s32.totalorder %s2026_s17, %s2022_s16 }
  0x55   : > { %s2336_s4 = scalar_select %p59_p2, %s2026_s17, %s61_s11  }
  0x56   : > { %s345_s5 = sshll.u32 %s2610_s7, 4  ;;  %p74_p8 = scmp.ne.s32.totalorder %s2022_s16, %s2018_s15  ;;  %s346_s5 = int_to_ptr.hbm [resolvable:$true] %s345_s5 }
  0x57   : > { %1488 = dma.hbm_to_vmem [thread:$0]  (!%p2191_p5), %s346_s5, 128, %s348_s20, [#allocation16]  }
  0x58   : > { %2612 = sst [smem:[#allocation40_spill]] %s2336_s4  ;;  %p292_p9 = scmp.eq.s32.totalorder %s2175_s23, 7 }
  0x59   : > { %p298_p10 = scmp.eq.s32.totalorder %s1256_s18, 7  ;;  %p2345_p0 = por %p69_p7, %p68_p4 }
  0x5a   : > { %p2351_p5 = por %p75_p1, %p74_p8  ;;  %p2355_p2 = por %p292_p9, %p68_p4 }
  0x5b   : > { %p2359_p11 = por %p298_p10, %p74_p8  ;;  %s361_s12 = sand.u32 1, %s2026_s17  }
  0x5c   : > { %s2615_s11 = scalar_select %p2355_p2, 1, 0 }
  0x5d   : > { %s2617_s25 = scalar_select %p2359_p11, 1, 0 }
  0x5e   : > { %2616 = sst [smem:[#allocation41_spill]] %s2615_s11  ;;  %s1263_s2 = sshll.u32 %s2611_s14, 3 }
  0x5f   : > { %2618 = sst [smem:[#allocation42_spill]] %s2617_s25  ;;  %s1262_s21 = sshll.u32 %s361_s12, 3 }
  0x60   : > { %s2619_s20 = sld [smem:[#allocation43_spill]]  ;;  %s365_s4 = scalar_lea.vmem [#allocation3], %s1262_s21 }
  0x61   : > { %s2620_s18 = sld [smem:[#allocation39_spill]]  ;;  %s374_s15 = sshll.u32 %s365_s4, 4  ;;  %s375_s15 = int_to_ptr.vmem [resolvable:$true] %s374_s15 }
  0x62   : > { %p2621_p7 = scmp.lt.s32.totalorder %s2046_s22, 8  ;;  %s414_s14 = sshll.u32 %s2262_s0, 4  ;;  %s415_s14 = int_to_ptr.hbm [resolvable:$true] %s414_s14 }
  0x63   : > { %s406_s17 = scalar_lea.vmem [#allocation8], %s2244_s9  ;;  %s362_s11 = scalar_lea.sflag [#allocation4], %s361_s12 }
  0x64   : > { %p1490_p4 = pnand %p2621_p7, %p2345_p0  ;;  %s416_s25 = sshll.u32 %s406_s17, 4  ;;  %s417_s25 = int_to_ptr.vmem [resolvable:$true] %s416_s25 }
  0x65   : > { %1498 = dma.hbm_to_vmem [thread:$0]  (!%p2255_p6), %s415_s14, 64, %s417_s25, %s2266_s1  }
  0x66   : > { %s370_s6 = scalar_lea.hbm %s2619_s20, %s1263_s2  ;;  %469 = sbr.rel (%p2183_p3) target bundleno = 1795 (0x703), region = 56 }
  0x67   : > { %s372_s7 = sshll.u32 %s370_s6, 4  ;;  %s2622_s6 = int_to_ptr.vmem [resolvable:$true] %s2620_s18  ;;  %s373_s7 = int_to_ptr.hbm [resolvable:$true] %s372_s7 }
  0x68   : > { %1492 = dma.hbm_to_vmem [thread:$0]  (!%p1490_p4), %s373_s7, 128, %s375_s15, %s362_s11  }
  0x69   : > { %1504 = dma.hbm_to_vmem [thread:$0]  (!%p2296_p12), %s2315_s27, 1024, %s2622_s6, %s2307_s19, %s2608_s3, %s2608_s3, %s2607_s8  }
  0x6a   : > { %s2389_s0 = sand.u32 (!%p2183_p3), 1, %s2022_s16  }
  0x6b   : > { %s1277_s9 = sshll.u32 %s2389_s0, 3  ;;  %s472_s17 = scalar_lea.sflag [#allocation4], %s2389_s0 }
  0x6c   : > { %s2393_s7 = scalar_lea.vmem [#allocation3], %s1277_s9 }
  0x6d   : > { %1969 = dma.done.wait (%p2351_p5), %s472_s17, 128  }
  0x6e   : > { %1971 = vsyncadd (%p2351_p5), %s472_s17, 4294967168  ;;  %s2624_s1 = sld [smem:[#allocation25_spill]]  ;;  %s481_s15 = sand.u32 1, %s2175_s23  }
  0x6f   : > { %s482_s27 = scalar_lea.sflag [#allocation7], %s481_s15 }
  0x74   : > { %s483_s28 = sand.u32 1, %s2624_s1  }
  0x75   : > { %s2401_s30 = sshll.u32 %s483_s28, 2 }
  0x76   : > { %s485_s19 = scalar_lea.vmem [#allocation6], %s2401_s30 }
  0x77   : > { %1973 = dma.done.wait (%p2226_p13), %s482_s27, 128  }
  0x78   : > { %1975 = vsyncadd (%p2226_p13), %s482_s27, 4294967168  ;;  %s503_s8 = sand.u32 1, %s1998_s10   ;;  %s495_s24 = scalar_lea.vmem [#allocation8], %s2401_s30 }
  0x79   : > { %s1280_s26 = sshll.u32 %s503_s8, 6  ;;  %s502_s11 = scalar_lea.sflag [#allocation10], %s481_s15 }
  0x7a   : > { %s505_s25 = scalar_lea.vmem [#allocation9], %s1280_s26  ;;  %p2626_p3 = scmp.ne.s32.totalorder %s2601_s29, 0 }
  0x7c   : > { %1977 = dma.done.wait (%p2626_p3), %s502_s11, 2048  }
  0x7d   : > { %1979 = vsyncadd (%p2626_p3), %s502_s11, 4294965248  ;;  %s2414_s12 = scalar_lea.vmem [#allocation11], %s1280_s26 }
  0x7e   : > { %1981 = dma.done.wait (%p75_p1), [#allocation13], 2048  }
  0x7f   : > { %1983 = vsyncadd (%p75_p1), [#allocation13], 4294965248 }
  0x80   : > { %1985 = dma.done.wait (%p75_p1), [#allocation16], 128  }
  0x81   : > { %1987 = vsyncadd (%p75_p1), [#allocation16], 4294967168  ;;  %s2424_s2 = scalar_lea.vmem [#allocation17], %s1277_s9  ;;  %s2627_s21 = sld [smem:[#allocation29_spill]] }
  0x87   : > { %p1286_p13 = scmp.ne.s32.totalorder %s2627_s21, 0 }
  0x89   : > { %590 = sbr.rel (%p1286_p13) target bundleno = 144 (0x90), region = 92 }
  0x8e   : > { %v2053_v0 = vmov 0.0  }
  0x8f   : > { %591 = vst [vmem:[#allocation2] sm:$0xff] %v2053_v0 }
  0x90 PF: > { %v1430_v1 = vld [vmem:[%s505_s25 + $0x38] sm:$0xff]  ;;  %v1429_v2 = vld [vmem:[%s505_s25 + $0x30] sm:$0xff]  ;;  %v1428_v4 = vld [vmem:[%s505_s25 + $0x28] sm:$0xff]  ;;  %vm687_vm0 = vcmask 64512   ;;  %vm707_vm1 = vcmask 1043456   ;;  %s2628_s23 = sld [smem:[#allocation29_spill]] }
  0x91   : > { %660 = vmatpush.bf16.msra.mxu0 %v1430_v1  ;;  %v593_v3 = vld [vmem:[%s485_s19] sm:$0xf]  ;;  %v1427_v5 = vld [vmem:[%s505_s25 + $0x20] sm:$0xff]  ;;  %v1426_v6 = vld [vmem:[%s505_s25 + $0x18] sm:$0xff] }
  0x92   : > { %681 = vmatpush.bf16.xpose.msra.mxu1 %v593_v3  ;;  %v1425_v7 = vld [vmem:[%s505_s25 + $0x10] sm:$0xff]  ;;  %v1424_v8 = vld [vmem:[%s505_s25 + $0x8] sm:$0xff]  ;;  %v1423_v9 = vld [vmem:[%s505_s25] sm:$0xff] }
  0x93   : > { %v2428_v10 = vld [vmem:[%s2393_s7] sm:$0xff]  ;;  %v594_v27 = vld [vmem:[%s495_s24] sm:$0xf]  ;;  %v1437_v30 = vld [vmem:[%s2414_s12 + $0x30] sm:$0xff] }
  0x94   : > { %v595_v11 = vpack.c.bf16 %v2428_v10, %v2428_v10  ;;  %v709_v28 = vsel %vm707_vm1, %v594_v27, 0  ;;  %v1438_v29 = vld [vmem:[%s2414_s12 + $0x38] sm:$0xff]  ;;  %v1436_v31 = vld [vmem:[%s2414_s12 + $0x28] sm:$0xff]  ;;  %v1435_v32 = vld [vmem:[%s2414_s12 + $0x20] sm:$0xff] }
  0x95   : > { %661 = vmatpush.bf16.msra.mxu0 %v1429_v2  ;;  %718 = vmatpush.bf16.msra.mxu2 %v709_v28  ;;  %v1434_v33 = vld [vmem:[%s2414_s12 + $0x18] sm:$0xff]  ;;  %v1433_v34 = vld [vmem:[%s2414_s12 + $0x10] sm:$0xff]  ;;  %v1432_v36 = vld [vmem:[%s2414_s12 + $0x8] sm:$0xff] }
  0x96   : > { %790 = vmatpush.bf16.msra.mxu3 %v1438_v29  ;;  %v1431_v40 = vld [vmem:[%s2414_s12] sm:$0xff]  ;;  %v724_v44 = vld [vmem:[#allocation2] sm:$0xff]  ;;  %p1352_p1 = scmp.ne.s32.totalorder %s2628_s23, 3 }
  0x97   : > { %s2629_s13 = sld [smem:[#allocation51_spill]] (!%p1352_p1) }
  0x99   : > { %662 = vmatpush.bf16.msra.mxu0 %v1428_v4 }
  0x9a   : > { %791 = vmatpush.bf16.msra.mxu3 %v1437_v30 }
  0x9d   : > { %663 = vmatpush.bf16.msra.mxu0 %v1427_v5 }
  0x9e   : > { %792 = vmatpush.bf16.msra.mxu3 %v1436_v31 }
  0xa1   : > { %664 = vmatpush.bf16.msra.mxu0 %v1426_v6 }
  0xa2   : > { %793 = vmatpush.bf16.msra.mxu3 %v1435_v32 }
  0xa5   : > { %665 = vmatpush.bf16.msra.mxu0 %v1425_v7 }
  0xa6   : > { %794 = vmatpush.bf16.msra.mxu3 %v1434_v33 }
  0xa9   : > { %666 = vmatpush.bf16.msra.mxu0 %v1424_v8 }
  0xaa   : > { %795 = vmatpush.bf16.msra.mxu3 %v1433_v34 }
  0xad   : > { %667 = vmatpush.bf16.msra.mxu0 %v1423_v9 }
  0xae   : > { %796 = vmatpush.bf16.msra.mxu3 %v1432_v36 }
  0xb0   : > { %668 = vmatmul.bf16.vlgmr.msra.gmra.mxu0 %v595_v11 }
  0xb2   : > { %797 = vmatpush.bf16.msra.mxu3 %v1431_v40 }
 0x12d   : > { %v669_v12 = vpop.f32.mrf.mxu0 }
 0x12e   : > { %v673_v13 = vpack.c.bf16 %v669_v12, %v669_v12 }
 0x130   : > { %682 = vmatmul.bf16.vlgmr.msra.gmra.mxu1 %v673_v13 }
 0x135   : > { %v671_v14 = vpop.f32.mrf.mxu0 }
 0x1ad   : > { %v683_v15 = vpop.f32.mrf.mxu1 }
 0x1ae   : > { %v688_v16 = vsel %vm687_vm0, %v683_v15, -inf }
 0x1af   : > { %689 = vmax.xlane.f32.xlu0 %v688_v16 }
 0x1b5   : > { %v685_v17 = vpop.f32.mrf.mxu1 }
 0x222   : > { %v690_v18 = vpop.xlane.xlu0 %689 }
 0x223   : > { %v691_v19 = vsub.f32 %v683_v15, %v690_v18 }
 0x225   : > { %v692_v20 = vpack.c.bf16 %v691_v19, %v691_v19 }
 0x227   : > { %v693_v21 = vunpack.c.l.bf16 %v692_v20 }
 0x229   : > { %v694_v22 = vmul.f32 1.442695, %v693_v21 }
 0x22b   : > { %1635 = vpow2.f32 %v694_v22 }
 0x231   : > { %v1636_v23 = vpop.eup %1635 }
 0x232   : > { %v696_v24 = vpack.c.bf16 %v1636_v23, %v1636_v23 }
 0x234   : > { %v697_v25 = vunpack.c.l.bf16 %v696_v24 }
 0x236   : > { %v698_v26 = vsel %vm687_vm0, %v697_v25, 0.0 }
 0x237   : > { %699 = vadd.xlane.f32.xlu0 %v698_v26 }
 0x2aa   : > { %v700_v35 = vpop.xlane.xlu0 %699 }
 0x2ab   : > { %1637 = vrcp.f32 %v700_v35 }
 0x2b1   : > { %v1638_v37 = vpop.eup %1637 }
 0x2b2   : > { %v702_v38 = vmul.f32 %v1638_v37, %v697_v25 }
 0x2b4   : > { %v703_v39 = vpack.c.bf16 %v702_v38, %v702_v38 }
 0x2b6   : > { %1319 = vmatmul.msk.bf16.vlgmr.msra.gmra.mxu2 %vm687_vm0, %v703_v39 }
 0x339   : > { %v720_v41 = vpop.f32.mrf.mxu2 }
 0x33a   : > { %v725_v42 = vpack.c.bf16 %v720_v41, %v720_v41 }
 0x33c   : > { %798 = vmatmul.bf16.vlgmr.msra.gmra.mxu3 %v725_v42 }
 0x341   : > { %v722_v43 = vpop.f32.mrf.mxu2 }
 0x3bf   : > { %v799_v45 = vpop.f32.mrf.mxu3 }
 0x3c0   : > { %v803_v46 = vadd.f32 %v799_v45, %v724_v44 }
 0x3c2   : > { %804 = vst [vmem:[#allocation2] sm:$0xff] %v803_v46 }
 0x3c3   : > { %808 = sbr.rel (%p1352_p1) target bundleno = 1774 (0x6ee), region = 96 }
 0x3c7   : > { %v801_v47 = vpop.f32.mrf.mxu3 }
 0x3c8   : > { %v2446_v48 = vld [vmem:[#allocation15] sm:$0xff]  ;;  %v1446_v53 = vld [vmem:[#allocation12 + $0x38] sm:$0xff]  ;;  %v810_v54 = vlaneseq  ;;  %v1445_v61 = vld [vmem:[#allocation12 + $0x30] sm:$0xff] }
 0x3c9   : > { %v813_v49 = vld [vmem:[#allocation2] sm:$0xff]  ;;  %v814_v50 = vperm.slane %v2446_v48, 0  ;;  %913 = vmatpush.bf16.msra.mxu0 %v1446_v53  ;;  %v1444_v62 = vld [vmem:[#allocation12 + $0x28] sm:$0xff]  ;;  %v1443_v63 = vld [vmem:[#allocation12 + $0x20] sm:$0xff]  ;;  %v840_v19 = vperm.slane %v2446_v48, 1  ;;  %v842_v22 = vperm.slane %v2446_v48, 2 }
 0x3ca   : > { %v2450_v55 = vand.u32 127, %v810_v54  ;;  %v1442_v0 = vld [vmem:[#allocation12 + $0x18] sm:$0xff]  ;;  %v1441_v1 = vld [vmem:[#allocation12 + $0x10] sm:$0xff]  ;;  %v1440_v2 = vld [vmem:[#allocation12 + $0x8] sm:$0xff]  ;;  %v944_v34 = vperm.slane %v2446_v48, 3  ;;  %v1028_v54 = vperm.slane %v2446_v48, 4 }
 0x3cb   : > { %v815_v51 = vadd.f32 %v814_v50, %v813_v49  ;;  %v1439_v3 = vld [vmem:[#allocation12] sm:$0xff]  ;;  %v1454_v4 = vld [vmem:[#allocation14 + $0x38] sm:$0xff]  ;;  %v1453_v7 = vld [vmem:[#allocation14 + $0x30] sm:$0xff] }
 0x3cc   : > { %vm812_vm2 = vcmp.lt.s32.totalorder %v2450_v55, 32  ;;  %993 = vmatpush.bf16.msra.mxu1 %v1454_v4  ;;  %v1452_v9 = vld [vmem:[#allocation14 + $0x28] sm:$0xff]  ;;  %v1450_v13 = vld [vmem:[#allocation14 + $0x18] sm:$0xff]  ;;  %v1449_v16 = vld [vmem:[#allocation14 + $0x10] sm:$0xff] }
 0x3cd   : > { %v816_v52 = vadd.f32 %v815_v51, %v2428_v10  ;;  %914 = vmatpush.bf16.msra.mxu0 %v1445_v61  ;;  %v1451_v10 = vld [vmem:[#allocation14 + $0x20] sm:$0xff]  ;;  %v1448_v26 = vld [vmem:[#allocation14 + $0x8] sm:$0xff]  ;;  %v1639_v28 = vld [vmem:[%s2629_s13] ss:$0 sm:$0xff] }
 0x3ce   : > { %v1447_v27 = vld [vmem:[#allocation14] sm:$0xff] }
 0x3cf   : > { %817 = vadd.xlane.f32.xlu0 %v816_v52 }
 0x3d0   : > { %994 = vmatpush.bf16.msra.mxu1 %v1453_v7 }
 0x3d1   : > { %915 = vmatpush.bf16.msra.mxu0 %v1444_v62 }
 0x3d4   : > { %995 = vmatpush.bf16.msra.mxu1 %v1452_v9 }
 0x3d5   : > { %916 = vmatpush.bf16.msra.mxu0 %v1443_v63 }
 0x3d8   : > { %996 = vmatpush.bf16.msra.mxu1 %v1451_v10 }
 0x3d9   : > { %917 = vmatpush.bf16.msra.mxu0 %v1442_v0 }
 0x3dc   : > { %997 = vmatpush.bf16.msra.mxu1 %v1450_v13 }
 0x3dd   : > { %918 = vmatpush.bf16.msra.mxu0 %v1441_v1 }
 0x3e0   : > { %998 = vmatpush.bf16.msra.mxu1 %v1449_v16 }
 0x3e1   : > { %919 = vmatpush.bf16.msra.mxu0 %v1440_v2 }
 0x3e4   : > { %999 = vmatpush.bf16.msra.mxu1 %v1448_v26 }
 0x3e5   : > { %920 = vmatpush.bf16.msra.mxu0 %v1439_v3 }
 0x3e8   : > { %1000 = vmatpush.bf16.msra.mxu1 %v1447_v27 }
 0x442   : > { %v818_v56 = vpop.xlane.xlu0 %817 }
 0x443   : > { %v819_v57 = vmul.f32 0.03125, %v818_v56  ;;  %v1030_v56 = vperm.slane %v2446_v48, 5 }
 0x445   : > { %v820_v58 = vsub.f32 %v816_v52, %v819_v57 }
 0x447   : > { %v823_v59 = vsel %vm812_vm2, %v820_v58, 0.0 }
 0x448   : > { %v824_v60 = vmul.f32 %v823_v59, %v823_v59 }
 0x44a   : > { %825 = vadd.xlane.f32.xlu0 %v824_v60 }
 0x4bd   : > { %v826_v5 = vpop.xlane.xlu0 %825 }
 0x4be   : > { %v827_v6 = vmul.f32 0.03125, %v826_v5 }
 0x4c0   : > { %v828_v8 = vadd.f32 1e-05, %v827_v6 }
 0x4c2   : > { %1640 = vrsqrt.f32 %v828_v8  ;;  %vm835_vm4 = vweird.f32 %v828_v8 }
 0x4c8   : > { %v1641_v11 = vpop.eup %1640 }
 0x4c9   : > { %v830_v12 = vmul.f32 %v1641_v11, %v828_v8  ;;  %vm836_vm3 = vweird.f32 %v1641_v11 }
 0x4ca   : > { %vm837_vm5 = vmor %vm835_vm4, %vm836_vm3 }
 0x4cb   : > { %v831_v14 = vmul.f32 %v1641_v11, %v830_v12 }
 0x4cd   : > { %v832_v15 = vmul.f32 0.5, %v831_v14 }
 0x4cf   : > { %v833_v17 = vsub.f32 1.5, %v832_v15 }
 0x4d1   : > { %v834_v18 = vmul.f32 %v1641_v11, %v833_v17 }
 0x4d3   : > { %v838_v20 = vsel %vm837_vm5, %v1641_v11, %v834_v18 }
 0x4d4   : > { %v839_v21 = vmul.f32 %v838_v20, %v823_v59 }
 0x4d6   : > { %v841_v23 = vmul.f32 %v840_v19, %v839_v21 }
 0x4d8   : > { %v843_v24 = vadd.f32 %v842_v22, %v841_v23 }
 0x4da   : > { %v844_v25 = vpack.c.bf16 %v843_v24, %v843_v24 }
 0x4dc   : > { %921 = vmatmul.bf16.vlgmr.msra.gmra.mxu0 %v844_v25 }
 0x559   : > { %v922_v29 = vpop.f32.mrf.mxu0 }
 0x55a   : > { %v923_v30 = vadd.f32 %v1639_v28, %v922_v29 }
 0x55c   : > { %v926_v31 = vmax.f32 %v923_v30, 0.0 }
 0x55e   : > { %v927_v32 = vpack.c.bf16 %v926_v31, %v926_v31 }
 0x560   : > { %1001 = vmatmul.bf16.vlgmr.msra.gmra.mxu1 %v927_v32 }
 0x561   : > { %v924_v33 = vpop.f32.mrf.mxu0 }
 0x5dd   : > { %v1002_v35 = vpop.f32.mrf.mxu1 }
 0x5de   : > { %v1003_v36 = vadd.f32 %v1002_v35, %v944_v34 }
 0x5e0   : > { %v1006_v37 = vadd.f32 %v1003_v36, %v843_v24 }
 0x5e2   : > { %1007 = vadd.xlane.f32.xlu1 %v1006_v37 }
 0x5e5   : > { %v1004_v38 = vpop.f32.mrf.mxu1 }
 0x655   : > { %v1008_v39 = vpop.xlane.xlu1 %1007 }
 0x656   : > { %v1009_v40 = vmul.f32 0.03125, %v1008_v39 }
 0x658   : > { %v1010_v41 = vsub.f32 %v1006_v37, %v1009_v40 }
 0x65a   : > { %v1011_v42 = vsel %vm812_vm2, %v1010_v41, 0.0 }
 0x65b   : > { %v1012_v43 = vmul.f32 %v1011_v42, %v1011_v42 }
 0x65d   : > { %1013 = vadd.xlane.f32.xlu1 %v1012_v43 }
 0x6d0   : > { %v1014_v44 = vpop.xlane.xlu1 %1013 }
 0x6d1   : > { %v1015_v45 = vmul.f32 0.03125, %v1014_v44 }
 0x6d3   : > { %v1016_v46 = vadd.f32 1e-05, %v1015_v45 }
 0x6d5   : > { %1642 = vrsqrt.f32 %v1016_v46  ;;  %vm1023_vm7 = vweird.f32 %v1016_v46 }
 0x6db   : > { %v1643_v47 = vpop.eup %1642 }
 0x6dc   : > { %v1018_v49 = vmul.f32 %v1643_v47, %v1016_v46  ;;  %vm1024_vm6 = vweird.f32 %v1643_v47 }
 0x6dd   : > { %vm1025_vm8 = vmor %vm1023_vm7, %vm1024_vm6 }
 0x6de   : > { %v1019_v50 = vmul.f32 %v1643_v47, %v1018_v49 }
 0x6e0   : > { %v1020_v51 = vmul.f32 0.5, %v1019_v50 }
 0x6e2   : > { %v1021_v52 = vsub.f32 1.5, %v1020_v51 }
 0x6e4   : > { %v1022_v53 = vmul.f32 %v1643_v47, %v1021_v52 }
 0x6e6   : > { %v1026_v55 = vsel %vm1025_vm8, %v1643_v47, %v1022_v53 }
 0x6e7   : > { %v1027_v57 = vmul.f32 %v1026_v55, %v1011_v42 }
 0x6e9   : > { %v1029_v58 = vmul.f32 %v1028_v54, %v1027_v57 }
 0x6eb   : > { %v1031_v59 = vadd.f32 %v1030_v56, %v1029_v58 }
 0x6ed   : > { %1032 = vst [vmem:[%s2424_s2] sm:$0xff] %v1031_v59 }
 0x6ee PF: > { %s2630_s20 = sld [smem:[#allocation30_spill]]  ;;  %s1047_s7 = sshll.u32 %s2424_s2, 4  ;;  %s1048_s7 = int_to_ptr.vmem [resolvable:$true] %s1047_s7 }
 0x6ef   : > { %s2632_s9 = sld [smem:[#allocation52_spill]]  ;;  %s1034_s3 = scalar_lea.sflag [#allocation5], %s2389_s0 }
 0x6f4   : > { %s1418_s14 = sshll.u32 %s2630_s20, 3 }
 0x6f5   : > { %s1045_s17 = scalar_lea.hbm %s2632_s9, %s1418_s14  ;;  %s1904_s19 = scalar_lea.hbm %s2632_s9, 16 }
 0x6f6   : > { %s1049_s1 = sshll.u32 %s1045_s17, 4  ;;  %s1050_s1 = int_to_ptr.hbm [resolvable:$true] %s1049_s1 }
 0x6f7   : > { %s1898_s15 = sshra.s32 %s1050_s1, 4  ;;  %s1899_s15 = int_to_ptr.hbm [resolvable:$true] %s1898_s15 }
 0x6f8   : > { %s1900_s28 = scalar_lea.hbm %s1899_s15, 8  ;;  %p1905_p8 = scmp.lt.s32.totalorder %s1899_s15, %s2632_s9 }
 0x6f9   : > { %p1901_p0 = scmp.ne.s32.totalorder %s1899_s15, %s1900_s28  ;;  %p1906_p9 = scmp.lt.s32.totalorder %s1904_s19, %s1900_s28 }
 0x6fb   : > { %p1902_p6 = pnand %p1901_p0, %p2355_p2  ;;  %p1907_p10 = por %p1906_p9, %p1905_p8 }
 0x6fd   : > { %p1903_p12 = pneg %p1902_p6 }
 0x6ff   : > { %p1908_p5 = pnand %p1907_p10, %p1903_p12 }
 0x701   : > { %1911 = shalt.err (!%p1908_p5)
}
 0x702   : > { %1477 = dma.vmem_to_hbm [thread:$0]  (%p2355_p2), %s1048_s7, 128, %s1050_s1, %s1034_s3  }
 0x703 PF: > { %s2633_s0 = sld [smem:[#allocation27_spill]]  ;;  %p1516_p7 = scmp.ge.s32.totalorder %s2046_s22, 2 }
 0x705   : > { %p1506_p4 = pnand %p1516_p7, %p2359_p11 }
 0x707   : > { %p1507_p3 = pneg %p1506_p4 }
 0x709   : > { %s1061_s11 = sand.u32 1, %s2633_s0  }
 0x70a   : > { %s1062_s25 = scalar_lea.sflag [#allocation5], %s1061_s11 }
 0x70b   : > { %1989 = dma.done.wait (%p1507_p3), %s1062_s25, 128  }
 0x70c   : > { %1991 = vsyncadd (%p1507_p3), %s1062_s25, 4294967168  ;;  %s33_s22 = sadd.s32 1, %s2046_s22   ;;  %s2636_s2 = sld [smem:[#allocation24_spill]] }
 0x70d   : > { %p2487_p13 = scmp.ge.s32.totalorder %s33_s22, 10   ;;  %s2637_s11 = sld [smem:[#allocation38_spill]] }
 0x70e   : > { %s2638_s21 = sld [smem:[#allocation25_spill]]  ;;  %s2648_s30 = smov %s1998_s10 }
 0x70f   : > { %s2639_s13 = sld [smem:[#allocation26_spill]]  ;;  %s2651_s15 = smov %s2022_s16 }
 0x710   : > { %s2640_s14 = sld [smem:[#allocation37_spill]] }
 0x711   : > { %s2641_s23 = sld [smem:[#allocation28_spill]] }
 0x712   : > { %s2642_s17 = sld [smem:[#allocation40_spill]]  ;;  %s2649_s10 = smov %s2636_s2 }
 0x713   : > { %s2643_s18 = sld [smem:[#allocation31_spill]] }
 0x714   : > { %s2644_s19 = sld [smem:[#allocation32_spill]]  ;;  %s2650_s12 = smov %s2638_s21 }
 0x715   : > { %s2645_s20 = sld [smem:[#allocation34_spill]] }
 0x716   : > { %s2646_s29 = sld [smem:[#allocation35_spill]] }
 0x717   : > { %s2652_s16 = smov %s2641_s23 }
 0x718   :  { %32 = sbr.rel (!%p2487_p13) target bundleno = 27 (0x1b), region = 169 }
 0x71c   : > { %s2653_s21 = smov %s2646_s29 }
 0x71d   :  { %1068 = vsyncpa [#allocation4], 1 }
 0x71e   :  { %1070 = vsyncpa [#allocation4 + $0x1], 1 }
 0x71f   :  { %1071 = vsyncpa [#allocation7], 1 }
 0x720   :  { %1073 = vsyncpa [#allocation7 + $0x1], 1 }
 0x721   :  { %1074 = vsyncpa [#allocation10], 1 }
 0x722   :  { %1076 = vsyncpa [#allocation10 + $0x1], 1 }
 0x723   :  { %1077 = vsyncpa [#allocation13], 1 }
 0x724   :  { %1078 = vsyncpa [#allocation16], 1 }
 0x725   :  { %1079 = vsyncpa [#allocation5], 1 }
 0x726   :  { %1081 = vsyncpa [#allocation5 + $0x1], 1 }

</bundles_post_ra>
